<compile_context>
chip_gen: v7x
topology: tpu7x:2x2x1
jax: 0.10.0
libtpu: 0.0.40
codegen_flags: <defaults>
</compile_context>

<pallas_src>
import jax
import jax.numpy as jnp
from jax.experimental import pallas as pl
from jax.experimental.pallas import tpu as pltpu


def _round_up(x, m):
    return ((x + m - 1) // m) * m


# ---------------------------------------------------------------------------
# Pallas kernel: 3-layer MLP  Linear->ReLU->Linear->ReLU->Linear->Sigmoid, *5
# ---------------------------------------------------------------------------
def _mlp_kernel(x_ref, w1_ref, b1_ref, w2_ref, b2_ref, w3_ref, b3_ref, o_ref):
    # x_ref : (TB, Dp)  bf16   (batch tile, zero-padded feature dim)
    # w1_ref: (Dp, H1)  bf16   b1_ref: (1, H1) f32
    # w2_ref: (H1, H2)  bf16   b2_ref: (1, H2) f32
    # w3_ref: (1, H2)   f32    b3_ref: (1, 1)  f32
    # o_ref : (1, TB)   f32    (lane-dense output row for this batch tile)
    x = x_ref[...]

    # Layer 1: MXU matmul (bf16 operands, f32 accumulate) + bias + ReLU.
    h1 = jnp.dot(x, w1_ref[...], preferred_element_type=jnp.float32)
    h1 = jnp.maximum(h1 + b1_ref[...], 0.0)
    # Dropout(p) -> identity in eval mode.

    # Layer 2: MXU matmul + bias + ReLU.
    h2 = jnp.dot(h1.astype(w2_ref.dtype), w2_ref[...],
                 preferred_element_type=jnp.float32)
    h2 = jnp.maximum(h2 + b2_ref[...], 0.0)

    # Layer 3 has a single output unit: do it as a VPU broadcast-multiply +
    # cross-lane reduce (XLU) instead of spending an MXU pass on (TB,64)x(64,1).
    logits = jnp.sum(h2 * w3_ref[...], axis=-1) + b3_ref[0, 0]        # (TB,)

    # Sigmoid (EUP) and the *5 scaling, stored lane-dense.
    o_ref[0, :] = jax.nn.sigmoid(logits) * 5.0


def mlp_pallas(x, w1, b1, w2, b2, w3, b3, *, tile_b=512):
    """y = sigmoid(relu(relu(x@W1+b1)@W2+b2)@W3+b3) * 5, returned as (B,)."""
    B, D_in = x.shape
    H1 = w1.shape[1]
    H2 = w2.shape[1]

    # --- alignment / padding -------------------------------------------------
    # Rows in multiples of 128 (MXU-friendly on all generations, incl. v5e's
    # 4x128 MXU); cap the tile for tiny batches so we don't pad 16 -> 512.
    tile_b = max(128, min(tile_b, _round_up(B, 128)))
    B_pad = _round_up(B, tile_b)
    # Feature dim 225 -> 256: aligned unmasked loads, clean MXU K depth.
    D_pad = _round_up(D_in, 128)

    x_p = jnp.pad(x, ((0, B_pad - B), (0, D_pad - D_in))).astype(jnp.bfloat16)
    w1_p = jnp.pad(w1, ((0, D_pad - D_in), (0, 0))).astype(jnp.bfloat16)
    w2_p = w2.astype(jnp.bfloat16)
    b1_p = b1.astype(jnp.float32)
    b2_p = b2.astype(jnp.float32)
    w3_row = w3.reshape(1, H2).astype(jnp.float32)    # (H2,1) -> (1,H2)
    b3_p = b3.reshape(1, 1).astype(jnp.float32)

    grid = (B_pad // tile_b,)

    out = pl.pallas_call(
        _mlp_kernel,
        out_shape=jax.ShapeDtypeStruct((1, B_pad), jnp.float32),
        grid_spec=pltpu.PrefetchScalarGridSpec(
            num_scalar_prefetch=0,
            grid=grid,
            in_specs=[
                pl.BlockSpec((tile_b, D_pad), lambda i: (i, 0)),   # x (batch-tiled)
                pl.BlockSpec((D_pad, H1), lambda i: (0, 0)),       # W1 (VMEM-resident)
                pl.BlockSpec((1, H1), lambda i: (0, 0)),           # b1
                pl.BlockSpec((H1, H2), lambda i: (0, 0)),          # W2
                pl.BlockSpec((1, H2), lambda i: (0, 0)),           # b2
                pl.BlockSpec((1, H2), lambda i: (0, 0)),           # W3 row
                pl.BlockSpec((1, 1), lambda i: (0, 0)),            # b3
            ],
            # Lane-dense output row: unmasked full-width stores.
            out_specs=pl.BlockSpec((1, tile_b), lambda i: (0, i)),
        ),
        compiler_params=pltpu.CompilerParams(
            dimension_semantics=("parallel",),
        ),
    )(x_p, w1_p, b1_p, w2_p, b2_p, w3_row, b3_p)

    return out[0, :B]


# ---------------------------------------------------------------------------
# Model: parameter construction + forward glue (embedding gathers / concat)
# ---------------------------------------------------------------------------
class HMRecommenderPallas:
    PODSTAWOWE = ["user_id", "item_id"]
    OPCJONALNE = ["product_type", "colour", "colour_master", "department", "index"]

    def __init__(self, liczba_kategorii, dim_embeddingu=32, hidden_dims=(128, 64),
                 key=jax.random.PRNGKey(0)):
        self.dim_embeddingu = dim_embeddingu
        self.cechy_kategoryczne = list(self.PODSTAWOWE)
        for cecha in self.OPCJONALNE:
            if cecha in liczba_kategorii:
                self.cechy_kategoryczne.append(cecha)

        keys = jax.random.split(key, len(self.cechy_kategoryczne) + 2 * (len(hidden_dims) + 1))
        kidx = 0

        self.embeddings = {}
        for nazwa in self.cechy_kategoryczne:
            n = liczba_kategorii[nazwa]
            self.embeddings[nazwa] = jax.random.normal(
                keys[kidx], (n, dim_embeddingu), dtype=jnp.float32)
            kidx += 1

        input_dim = len(self.cechy_kategoryczne) * dim_embeddingu + 1  # + price
        dims = [input_dim] + list(hidden_dims) + [1]
        self.weights = []
        self.biases = []
        for i in range(len(dims) - 1):
            fan_in, fan_out = dims[i], dims[i + 1]
            bound = 1.0 / (fan_in ** 0.5)
            w = jax.random.uniform(keys[kidx], (fan_in, fan_out),
                                   minval=-bound, maxval=bound, dtype=jnp.float32)
            kidx += 1
            b = jax.random.uniform(keys[kidx], (1, fan_out),
                                   minval=-bound, maxval=bound, dtype=jnp.float32)
            kidx += 1
            self.weights.append(w)
            self.biases.append(b)

    def __call__(self, batch):
        B = batch[self.PODSTAWOWE[0]].shape[0]
        # TODO(synk): could fuse the embedding gathers + price concat into the
        # kernel (scalar-prefetch indices + per-row DMA gather) to avoid
        # materializing x in HBM; kept in plain JAX here.
        feats = []
        for nazwa in self.cechy_kategoryczne:
            if nazwa in batch:
                idx = batch[nazwa].reshape(B)                      # squeeze(1)
                feats.append(jnp.take(self.embeddings[nazwa], idx, axis=0))
            else:
                feats.append(jnp.zeros((B, self.dim_embeddingu), dtype=jnp.float32))
        feats.append(batch["price"].astype(jnp.float32))           # (B, 1)
        x = jnp.concatenate(feats, axis=1)                         # (B, D_in)

        (w1, w2, w3), (b1, b2, b3) = self.weights, self.biases
        return mlp_pallas(x, w1, b1, w2, b2, w3, b3, tile_b=512)   # (B,), already *5


# ---------------------------------------------------------------------------
# Pure-JAX reference (f32) for a sanity check
# ---------------------------------------------------------------------------
def reference_forward(model, batch):
    B = batch[model.PODSTAWOWE[0]].shape[0]
    feats = []
    for nazwa in model.cechy_kategoryczne:
        if nazwa in batch:
            idx = batch[nazwa].reshape(B)
            feats.append(jnp.take(model.embeddings[nazwa], idx, axis=0))
        else:
            feats.append(jnp.zeros((B, model.dim_embeddingu), dtype=jnp.float32))
    feats.append(batch["price"].astype(jnp.float32))
    x = jnp.concatenate(feats, axis=1)
    h = jnp.maximum(x @ model.weights[0] + model.biases[0], 0.0)
    h = jnp.maximum(h @ model.weights[1] + model.biases[1], 0.0)
    logits = h @ model.weights[2] + model.biases[2]
    return jax.nn.sigmoid(logits)[:, 0] * 5.0


# ---------------------------------------------------------------------------
if __name__ == "__main__":
    key = jax.random.PRNGKey(0)

    liczba_kategorii = {
        "user_id": 50,
        "item_id": 40,
        "product_type": 10,
        "colour": 12,
        "colour_master": 6,
        "department": 8,
        "index": 5,
    }
    B = 16
    model = HMRecommenderPallas(liczba_kategorii, dim_embeddingu=32,
                                hidden_dims=(128, 64), key=key)

    # Deterministic batch; 'colour_master' deliberately omitted from the batch
    # (but present in liczba_kategorii) to exercise the zero-dummy path.
    ks = jax.random.split(jax.random.PRNGKey(0), 8)
    batch = {
        "user_id": jax.random.randint(ks[0], (B, 1), 0, 50, dtype=jnp.int32),
        "item_id": jax.random.randint(ks[1], (B, 1), 0, 40, dtype=jnp.int32),
        "product_type": jax.random.randint(ks[2], (B, 1), 0, 10, dtype=jnp.int32),
        "colour": jax.random.randint(ks[3], (B, 1), 0, 12, dtype=jnp.int32),
        "department": jax.random.randint(ks[4], (B, 1), 0, 8, dtype=jnp.int32),
        "index": jax.random.randint(ks[5], (B, 1), 0, 5, dtype=jnp.int32),
        "price": jax.random.uniform(ks[6], (B, 1), dtype=jnp.float32),
    }

    out = jax.block_until_ready(model(batch))
    ref = jax.block_until_ready(reference_forward(model, batch))

    assert out.shape == (B,)
    # bf16 MXU operands (f32 accumulation) -> loosened tolerance vs f32 reference.
    assert jnp.allclose(out, ref, atol=5e-2, rtol=5e-2), (out, ref)

    print("KERNEL_OK")
</pallas_src>

<mosaic_0001>
module attributes {stable_mosaic.version = 11 : i64} {
  func.func @_mlp_kernel(%arg0: i32, %arg1: memref<128x256xbf16, #tpu.memory_space<vmem>>, %arg2: memref<256x128xbf16, #tpu.memory_space<vmem>>, %arg3: memref<1x128xf32, #tpu.memory_space<vmem>>, %arg4: memref<128x64xbf16, #tpu.memory_space<vmem>>, %arg5: memref<1x64xf32, #tpu.memory_space<vmem>>, %arg6: memref<1x64xf32, #tpu.memory_space<vmem>>, %arg7: memref<1x1xf32, #tpu.memory_space<vmem>>, %arg8: memref<1x128xf32, #tpu.memory_space<vmem>>) attributes {dimension_semantics = [#tpu.dimension_semantics<parallel>], iteration_bounds = array<i64: 1>, scalar_prefetch = 0 : i64, scratch_operands = 0 : i64, tpu.core_type = #tpu.core_type<tc>, window_params = [{transform_indices = @transform_0, window_bounds = array<i64: 128, 256>}, {pipeline_mode = #tpu.pipeline_mode<synchronous>, transform_indices = @transform_1, window_bounds = array<i64: 256, 128>}, {pipeline_mode = #tpu.pipeline_mode<synchronous>, transform_indices = @transform_2, window_bounds = array<i64: 1, 128>}, {pipeline_mode = #tpu.pipeline_mode<synchronous>, transform_indices = @transform_3, window_bounds = array<i64: 128, 64>}, {pipeline_mode = #tpu.pipeline_mode<synchronous>, transform_indices = @transform_4, window_bounds = array<i64: 1, 64>}, {pipeline_mode = #tpu.pipeline_mode<synchronous>, transform_indices = @transform_5, window_bounds = array<i64: 1, 64>}, {pipeline_mode = #tpu.pipeline_mode<synchronous>, transform_indices = @transform_6, window_bounds = array<i64: 1, 1>}, {transform_indices = @transform_7, window_bounds = array<i64: 1, 128>}]} {
    %c0 = arith.constant 0 : index
    %c0_0 = arith.constant 0 : index
    %0 = vector.load %arg1[%c0, %c0_0] : memref<128x256xbf16, #tpu.memory_space<vmem>>, vector<128x256xbf16>
    %c0_1 = arith.constant 0 : index
    %c0_2 = arith.constant 0 : index
    %1 = vector.load %arg2[%c0_1, %c0_2] : memref<256x128xbf16, #tpu.memory_space<vmem>>, vector<256x128xbf16>
    %cst = arith.constant dense<0.000000e+00> : vector<128x128xf32>
    %2 = tpu.matmul %0, %1, %cst {dimension_numbers = #tpu.dot_dimension_numbers<[1], [0], [0], [1], [0, 0, 1, 1], [], []>} : vector<128x256xbf16>, vector<256x128xbf16>, vector<128x128xf32> -> vector<128x128xf32>
    %c0_3 = arith.constant 0 : index
    %c0_4 = arith.constant 0 : index
    %3 = vector.load %arg3[%c0_3, %c0_4] : memref<1x128xf32, #tpu.memory_space<vmem>>, vector<1x128xf32>
    %4 = vector.broadcast %3 : vector<1x128xf32> to vector<128x128xf32>
    %5 = arith.addf %2, %4 : vector<128x128xf32>
    %cst_5 = arith.constant 0.000000e+00 : f32
    %6 = vector.broadcast %cst_5 : f32 to vector<128x128xf32>
    %7 = arith.maximumf %5, %6 : vector<128x128xf32>
    %8 = arith.truncf %7 : vector<128x128xf32> to vector<128x128xbf16>
    %c0_6 = arith.constant 0 : index
    %c0_7 = arith.constant 0 : index
    %9 = vector.load %arg4[%c0_6, %c0_7] : memref<128x64xbf16, #tpu.memory_space<vmem>>, vector<128x64xbf16>
    %cst_8 = arith.constant dense<0.000000e+00> : vector<128x64xf32>
    %10 = tpu.matmul %8, %9, %cst_8 {dimension_numbers = #tpu.dot_dimension_numbers<[1], [0], [0], [1], [0, 0, 1, 1], [], []>} : vector<128x128xbf16>, vector<128x64xbf16>, vector<128x64xf32> -> vector<128x64xf32>
    %c0_9 = arith.constant 0 : index
    %c0_10 = arith.constant 0 : index
    %11 = vector.load %arg5[%c0_9, %c0_10] : memref<1x64xf32, #tpu.memory_space<vmem>>, vector<1x64xf32>
    %12 = vector.broadcast %11 : vector<1x64xf32> to vector<128x64xf32>
    %13 = arith.addf %10, %12 : vector<128x64xf32>
    %cst_11 = arith.constant 0.000000e+00 : f32
    %14 = vector.broadcast %cst_11 : f32 to vector<128x64xf32>
    %15 = arith.maximumf %13, %14 : vector<128x64xf32>
    %c0_12 = arith.constant 0 : index
    %c0_13 = arith.constant 0 : index
    %16 = vector.load %arg6[%c0_12, %c0_13] : memref<1x64xf32, #tpu.memory_space<vmem>>, vector<1x64xf32>
    %17 = vector.broadcast %16 : vector<1x64xf32> to vector<128x64xf32>
    %18 = arith.mulf %15, %17 : vector<128x64xf32>
    %cst_14 = arith.constant dense<0.000000e+00> : vector<128xf32>
    %19 = vector.multi_reduction <add>, %18, %cst_14 [1] : vector<128x64xf32> to vector<128xf32>
    %c0_15 = arith.constant 0 : index
    %c0_16 = arith.constant 0 : index
    %20 = vector.load %arg7[%c0_15, %c0_16] : memref<1x1xf32, #tpu.memory_space<vmem>>, vector<1x1xf32>
    %21 = vector.extract %20[0, 0] : f32 from vector<1x1xf32>
    %22 = vector.broadcast %21 : f32 to vector<128xf32>
    %23 = arith.addf %19, %22 : vector<128xf32>
    %24 = arith.negf %23 : vector<128xf32>
    %25 = math.exp %24 : vector<128xf32>
    %cst_17 = arith.constant 1.000000e+00 : f32
    %26 = vector.broadcast %cst_17 : f32 to vector<128xf32>
    %27 = arith.addf %26, %25 : vector<128xf32>
    %28 = arith.divf %26, %27 : vector<128xf32>
    %cst_18 = arith.constant 5.000000e+00 : f32
    %29 = vector.broadcast %cst_18 : f32 to vector<128xf32>
    %30 = arith.mulf %28, %29 : vector<128xf32>
    %c0_19 = arith.constant 0 : index
    %c0_20 = arith.constant 0 : index
    %31 = vector.load %arg8[%c0_19, %c0_20] : memref<1x128xf32, #tpu.memory_space<vmem>>, vector<1x128xf32>
    %32 = vector.shape_cast %31 : vector<1x128xf32> to vector<128xf32>
    %33 = vector.shape_cast %30 : vector<128xf32> to vector<1x128xf32>
    tpu.vector_store %arg8[%c0_19, %c0_20], %33 {strides = array<i32>} : memref<1x128xf32, #tpu.memory_space<vmem>>, vector<1x128xf32>,
    return
  }
  func.func @transform_0(%arg0: i32) -> (i32, i32) {
    %c0_i32 = arith.constant 0 : i32
    %c0_i32_0 = arith.constant 0 : i32
    return %arg0, %c0_i32 : i32, i32
  }
  func.func @transform_1(%arg0: i32) -> (i32, i32) {
    %c0_i32 = arith.constant 0 : i32
    %c0_i32_0 = arith.constant 0 : i32
    %c0_i32_1 = arith.constant 0 : i32
    return %c0_i32, %c0_i32_0 : i32, i32
  }
  func.func @transform_2(%arg0: i32) -> (i32, i32) {
    %c0_i32 = arith.constant 0 : i32
    %c0_i32_0 = arith.constant 0 : i32
    %c0_i32_1 = arith.constant 0 : i32
    return %c0_i32, %c0_i32_0 : i32, i32
  }
  func.func @transform_3(%arg0: i32) -> (i32, i32) {
    %c0_i32 = arith.constant 0 : i32
    %c0_i32_0 = arith.constant 0 : i32
    %c0_i32_1 = arith.constant 0 : i32
    return %c0_i32, %c0_i32_0 : i32, i32
  }
  func.func @transform_4(%arg0: i32) -> (i32, i32) {
    %c0_i32 = arith.constant 0 : i32
    %c0_i32_0 = arith.constant 0 : i32
    %c0_i32_1 = arith.constant 0 : i32
    return %c0_i32, %c0_i32_0 : i32, i32
  }
  func.func @transform_5(%arg0: i32) -> (i32, i32) {
    %c0_i32 = arith.constant 0 : i32
    %c0_i32_0 = arith.constant 0 : i32
    %c0_i32_1 = arith.constant 0 : i32
    return %c0_i32, %c0_i32_0 : i32, i32
  }
  func.func @transform_6(%arg0: i32) -> (i32, i32) {
    %c0_i32 = arith.constant 0 : i32
    %c0_i32_0 = arith.constant 0 : i32
    %c0_i32_1 = arith.constant 0 : i32
    return %c0_i32, %c0_i32_0 : i32, i32
  }
  func.func @transform_7(%arg0: i32) -> (i32, i32) {
    %c0_i32 = arith.constant 0 : i32
    %c0_i32_0 = arith.constant 0 : i32
    return %c0_i32, %arg0 : i32, i32
  }
}

</mosaic_0001>

<bundles_post_ra>
// kernel: tpu_custom_call.1
= control target key start
LH: loop header
LB: loop body
LE: loop exit
PB: predicated region body
PF: predicated region fallthrough
CT: control target
= control target key end

     0   :  { %s1555_s0 = inlined_call_operand.hbm [shape: bf16[128,256], index: 0, kind: input, shape index: {}]   ;;  %s1556_s1 = inlined_call_operand.hbm [shape: bf16[256,128], index: 1, kind: input, shape index: {}]   ;;  %s1557_s2 = inlined_call_operand.vmem [shape: f32[1,128], index: 2, kind: input, shape index: {}]   ;;  %s1558_s3 = inlined_call_operand.vmem [shape: bf16[128,64], index: 3, kind: input, shape index: {}]   ;;  %s1559_s4 = inlined_call_operand.vmem [shape: f32[1,64], index: 4, kind: input, shape index: {}]   ;;  %s1560_s5 = inlined_call_operand.vmem [shape: f32[1,64], index: 5, kind: input, shape index: {}]   ;;  %s1561_s6 = inlined_call_operand.<no memory space> [shape: f32[1,1], index: 6, kind: input, shape index: {}]   ;;  %s1562_s7 = inlined_call_operand.hbm [shape: f32[1,128], index: 7, kind: output, shape index: {}]  }
   0x1   :  { %v12_v0 = vstv %s1561_s6 }
   0x2   :  { %13 = vst [vmem:[#allocation2] sm:$0x1] %v12_v0 }
   0x3   :  { %14 = vsyncpa [#allocation4], 0 }
   0x4   :  { %15 = vsyncpa [#allocation7], 0 }
   0x5   :  { %16 = vsyncpa [#allocation5], 0  ;;  %s1306_s26 = smov [#allocation3]   ;;  %s1234_s30 = scalar_lea.hbm %s1555_s0, 2048 }
   0x6   :  { %s22_s27 = sshll.u32 %s1306_s26, 4  ;;  %p1235_p0 = scmp.ne.s32.totalorder %s1555_s0, %s1234_s30  ;;  %s23_s27 = int_to_ptr.vmem [resolvable:$true] %s22_s27 }
   0x7   :  { %p1238_p1 = scmp.lt.u32.totalorder %s1234_s30, %s1555_s0 }
   0x9   :  { %p1240_p2 = pnand %p1238_p1, %p1235_p0 }
   0xb   :  { %1243 = shalt.err (!%p1240_p2)
}
   0xc   :  { %s1244_s6 = scalar_lea.vmem %s23_s27, 2048  ;;  %p1249_p4 = scmp.lt.s32.totalorder %s23_s27, %s23_s27 }
   0xd   :  { %p1245_p3 = scmp.ne.s32.totalorder %s23_s27, %s1244_s6  ;;  %p1250_p5 = scmp.lt.s32.totalorder %s1244_s6, %s1244_s6 }
   0xf   :  { %p1251_p6 = por %p1250_p5, %p1249_p4 }
  0x11   :  { %p1252_p7 = pnand %p1251_p6, %p1245_p3 }
  0x13   :  { %1255 = shalt.err (!%p1252_p7)
}
  0x14   :  { %s1307_s12 = smov 128   ;;  %s1308_s13 = smov 8  }
  0x15   :  { %28 = dma.hbm_to_vmem [thread:$0]  %s1555_s0, 2048, %s23_s27, [#allocation4], %s1307_s12, %s1307_s12, %s1308_s13  }
  0x16   :  { %s1309_s16 = smov [#allocation6]   ;;  %s1256_s20 = scalar_lea.hbm %s1556_s1, 2048 }
  0x17   :  { %s34_s17 = sshll.u32 %s1309_s16, 4  ;;  %p1257_p8 = scmp.ne.s32.totalorder %s1556_s1, %s1256_s20  ;;  %s35_s17 = int_to_ptr.vmem [resolvable:$true] %s34_s17 }
  0x18   :  { %p1260_p9 = scmp.lt.u32.totalorder %s1256_s20, %s1556_s1 }
  0x1a   :  { %p1262_p10 = pnand %p1260_p9, %p1257_p8 }
  0x1c   :  { %1265 = shalt.err (!%p1262_p10)
}
  0x1d   :  { %s1266_s25 = scalar_lea.vmem %s35_s17, 2048  ;;  %p1271_p12 = scmp.lt.s32.totalorder %s35_s17, %s35_s17 }
  0x1e   :  { %p1267_p11 = scmp.ne.s32.totalorder %s35_s17, %s1266_s25  ;;  %p1272_p13 = scmp.lt.s32.totalorder %s1266_s25, %s1266_s25 }
  0x20   :  { %p1273_p0 = por %p1272_p13, %p1271_p12 }
  0x22   :  { %p1274_p1 = pnand %p1273_p0, %p1267_p11 }
  0x24   :  { %1277 = shalt.err (!%p1274_p1)
}
  0x25   :  { %s1310_s0 = smov 64   ;;  %s1311_s26 = smov 4  }
  0x26   :  { %40 = dma.hbm_to_vmem [thread:$0]  %s1556_s1, 2048, %s35_s17, [#allocation7], %s1310_s0, %s1310_s0, %s1311_s26  }
  0x27   :  { %1300 = dma.done.wait [#allocation4], 2048  }
  0x28   :  { %1301 = vsyncadd [#allocation4], 4294965248 }
  0x29   :  { %1302 = dma.done.wait [#allocation7], 2048  }
  0x2a   :  { %1303 = vsyncadd [#allocation7], 4294965248  ;;  %v1122_v1 = vld [vmem:[#allocation6 + $0x40] sm:$0xff]   ;;  %v1124_v3 = vld [vmem:[#allocation6 + $0x48] sm:$0xff]   ;;  %vm617_vm0 = vcmask 523264   ;;  %vm824_vm1 = vcmask 130112  }
  0x2b   :  { %v1123_v2 = vld [vmem:[#allocation6] sm:$0xff]   ;;  %1001 = vmatprep.subr.bf16.mxu0 %v1122_v1  ;;  %v1125_v4 = vld [vmem:[#allocation6 + $0x8] sm:$0xff]   ;;  %v1126_v5 = vld [vmem:[#allocation6 + $0x50] sm:$0xff]   ;;  %vm831_vm2 = vcmask 195712   ;;  %vm838_vm3 = vcmask 261312   ;;  %vm845_vm4 = vcmask 326912  }
  0x2c   :  { %1002 = vmatpush3.bf16.msra.mxu0 %v1123_v2  ;;  %v1127_v6 = vld [vmem:[#allocation6 + $0x10] sm:$0xff]   ;;  %v1128_v7 = vld [vmem:[#allocation6 + $0x58] sm:$0xff]   ;;  %v1130_v9 = vld [vmem:[#allocation6 + $0x60] sm:$0xff]   ;;  %vm852_vm5 = vcmask 392512   ;;  %vm859_vm6 = vcmask 458112   ;;  %vm866_vm7 = vcmask 523712  }
  0x2d   :  { %1003 = vmatprep.subr.bf16.mxu0 %v1124_v3  ;;  %v1129_v8 = vld [vmem:[#allocation6 + $0x18] sm:$0xff]   ;;  %v1131_v10 = vld [vmem:[#allocation6 + $0x20] sm:$0xff]   ;;  %v1132_v11 = vld [vmem:[#allocation6 + $0x68] sm:$0xff]   ;;  %vm873_vm8 = vcmask 589312   ;;  %vm880_vm9 = vcmask 654912   ;;  %vm887_vm10 = vcmask 720512  }
  0x2e   :  { %v1140_v12 = vld [vmem:[#allocation3 + $0x4] ss:$8 sps:$4 sm:$0xff]   ;;  %v1134_v14 = vld [vmem:[#allocation6 + $0x70] sm:$0xff]   ;;  %v1136_v16 = vld [vmem:[#allocation6 + $0x78] sm:$0xff]   ;;  %vm894_vm11 = vcmask 786112   ;;  %vm901_vm12 = vcmask 851712  }
  0x2f   :  { %v1133_v13 = vld [vmem:[#allocation6 + $0x28] sm:$0xff]   ;;  %321 = vmatprep.mubr.bf16.mxu0 %v1140_v12  ;;  %v1135_v15 = vld [vmem:[#allocation6 + $0x30] sm:$0xff]   ;;  %v1137_v17 = vld [vmem:[#allocation6 + $0x38] sm:$0xff]   ;;  %vm908_vm13 = vcmask 917312   ;;  %vm915_vm14 = vcmask 982912   ;;  %vm922_vm15 = vcmask 1048512  }
  0x30   :  { %1004 = vmatpush3.bf16.msra.mxu0 %v1125_v4  ;;  %v1162_v18 = vld [vmem:[%s1558_s3] sm:$0xff]   ;;  %v1163_v20 = vld [vmem:[%s1558_s3 + $0x8] sm:$0xff]   ;;  %v1164_v22 = vld [vmem:[%s1558_s3 + $0x10] sm:$0xff]  }
  0x31   :  { %1005 = vmatprep.subr.bf16.mxu0 %v1126_v5  ;;  %v1138_v19 = vld [vmem:[#allocation3] ss:$8 sps:$4 sm:$0xff]   ;;  %v1141_v21 = vld [vmem:[#allocation3 + $0x14] ss:$8 sps:$4 sm:$0xff]   ;;  %1081 = vmatprep.subr.bf16.mxu1 %v1162_v18  ;;  %v1143_v23 = vld [vmem:[#allocation3 + $0x10] ss:$8 sps:$4 sm:$0xff]  }
  0x32   :  { %1082 = vmatpush3.bf16.msra.mxu1 %v1162_v18  ;;  %v1144_v24 = vld [vmem:[#allocation3 + $0x24] ss:$8 sps:$4 sm:$0xff]   ;;  %v1146_v25 = vld [vmem:[#allocation3 + $0x20] ss:$8 sps:$4 sm:$0xff]   ;;  %v1147_v26 = vld [vmem:[#allocation3 + $0x34] ss:$8 sps:$4 sm:$0xff]  }
  0x33   :  { %1083 = vmatprep.subr.bf16.mxu1 %v1163_v20  ;;  %v1149_v27 = vld [vmem:[#allocation3 + $0x30] ss:$8 sps:$4 sm:$0xff]   ;;  %v1150_v28 = vld [vmem:[#allocation3 + $0x44] ss:$8 sps:$4 sm:$0xff]   ;;  %v1152_v29 = vld [vmem:[#allocation3 + $0x40] ss:$8 sps:$4 sm:$0xff]  }
  0x34   :  { %1006 = vmatpush3.bf16.msra.mxu0 %v1127_v6  ;;  %v1153_v30 = vld [vmem:[#allocation3 + $0x54] ss:$8 sps:$4 sm:$0xff]   ;;  %v1155_v31 = vld [vmem:[#allocation3 + $0x50] ss:$8 sps:$4 sm:$0xff]   ;;  %v1156_v32 = vld [vmem:[#allocation3 + $0x64] ss:$8 sps:$4 sm:$0xff]  }
  0x35   :  { %1007 = vmatprep.subr.bf16.mxu0 %v1128_v7  ;;  %v1158_v33 = vld [vmem:[#allocation3 + $0x60] ss:$8 sps:$4 sm:$0xff]   ;;  %v1159_v34 = vld [vmem:[#allocation3 + $0x74] ss:$8 sps:$4 sm:$0xff]   ;;  %v1161_v35 = vld [vmem:[#allocation3 + $0x70] ss:$8 sps:$4 sm:$0xff]  }
  0x36   :  { %1084 = vmatpush3.bf16.msra.mxu1 %v1163_v20  ;;  %v1165_v36 = vld [vmem:[%s1558_s3 + $0x18] sm:$0xff]   ;;  %v1166_v37 = vld [vmem:[%s1558_s3 + $0x20] sm:$0xff]   ;;  %v1167_v38 = vld [vmem:[%s1558_s3 + $0x28] sm:$0xff]  }
  0x37   :  { %1085 = vmatprep.subr.bf16.mxu1 %v1164_v22  ;;  %v1168_v39 = vld [vmem:[%s1558_s3 + $0x30] sm:$0xff]   ;;  %v1169_v40 = vld [vmem:[%s1558_s3 + $0x38] sm:$0xff]   ;;  %v1407_v43 = vld [vmem:[%s1557_s2] ss:$0 sm:$0xff] }
  0x38   :  { %1008 = vmatpush3.bf16.msra.mxu0 %v1129_v8 }
  0x39   :  { %1009 = vmatprep.subr.bf16.mxu0 %v1130_v9 }
  0x3a   :  { %1086 = vmatpush3.bf16.msra.mxu1 %v1164_v22 }
  0x3b   :  { %1087 = vmatprep.subr.bf16.mxu1 %v1165_v36 }
  0x3c   :  { %1010 = vmatpush3.bf16.msra.mxu0 %v1131_v10 }
  0x3d   :  { %1011 = vmatprep.subr.bf16.mxu0 %v1132_v11 }
  0x3e   :  { %1088 = vmatpush3.bf16.msra.mxu1 %v1165_v36 }
  0x3f   :  { %1089 = vmatprep.subr.bf16.mxu1 %v1166_v37 }
  0x40   :  { %1012 = vmatpush3.bf16.msra.mxu0 %v1133_v13 }
  0x41   :  { %1013 = vmatprep.subr.bf16.mxu0 %v1134_v14 }
  0x42   :  { %1090 = vmatpush3.bf16.msra.mxu1 %v1166_v37 }
  0x43   :  { %1091 = vmatprep.subr.bf16.mxu1 %v1167_v38 }
  0x44   :  { %1014 = vmatpush3.bf16.msra.mxu0 %v1135_v15 }
  0x45   :  { %1015 = vmatprep.subr.bf16.mxu0 %v1136_v16 }
  0x46   :  { %1092 = vmatpush3.bf16.msra.mxu1 %v1167_v38 }
  0x47   :  { %1093 = vmatprep.subr.bf16.mxu1 %v1168_v39 }
  0x48   :  { %1016 = vmatpush3.bf16.msra.mxu0 %v1137_v17 }
  0x4a   :  { %1094 = vmatpush3.bf16.msra.mxu1 %v1168_v39 }
  0x4b   :  { %322 = vmatmul.mubr.bf16.vlgmr.msra.gmra.mrb[0].mxu0 %v1138_v19  ;;  %1095 = vmatprep.subr.bf16.mxu1 %v1169_v40 }
  0x4c   :  { %329 = vmatprep.mubr.bf16.mxu0 %v1141_v21 }
  0x4e   :  { %1096 = vmatpush3.bf16.msra.mxu1 %v1169_v40 }
  0x53   :  { %330 = vmatmul.mubr.bf16.gmra.mrb[4].mxu0 %v1143_v23 }
  0x54   :  { %337 = vmatprep.mubr.bf16.mxu0 %v1144_v24 }
  0x5b   :  { %338 = vmatmul.mubr.bf16.gmra.mrb[8].mxu0 %v1146_v25 }
  0x5c   :  { %345 = vmatprep.mubr.bf16.mxu0 %v1147_v26 }
  0x63   :  { %346 = vmatmul.mubr.bf16.gmra.mrb[12].mxu0 %v1149_v27 }
  0x64   :  { %353 = vmatprep.mubr.bf16.mxu0 %v1150_v28 }
  0x6b   :  { %354 = vmatmul.mubr.bf16.gmra.mrb[16].mxu0 %v1152_v29 }
  0x6c   :  { %361 = vmatprep.mubr.bf16.mxu0 %v1153_v30 }
  0x73   :  { %362 = vmatmul.mubr.bf16.gmra.mrb[20].mxu0 %v1155_v31 }
  0x74   :  { %369 = vmatprep.mubr.bf16.mxu0 %v1156_v32 }
  0x7b   :  { %370 = vmatmul.mubr.bf16.gmra.mrb[24].mxu0 %v1158_v33 }
  0x7c   :  { %377 = vmatprep.mubr.bf16.mxu0 %v1159_v34 }
  0x83   :  { %378 = vmatmul.mubr.bf16.gmra.mrb[28].mxu0 %v1161_v35 }
 0x11e   :  { %v1017_v41 = vpop.f32.mrb[0].mxu0 }
 0x11f   :  { %v1018_v42 = vpop.f32.mrb[1].mxu0 }
 0x120   :  { %v1019_v44 = vadd.f32 %v1018_v42, %v1017_v41  ;;  %v1020_v45 = vpop.f32.mrb[2].mxu0 }
 0x121   :  { %v1021_v46 = vpop.f32.mrb[3].mxu0 }
 0x122   :  { %v1022_v47 = vadd.f32 %v1021_v46, %v1020_v45  ;;  %v324_v48 = vadd.f32 %v1019_v44, %v1407_v43 }
 0x124   :  { %v327_v49 = vadd.f32 %v1022_v47, %v1407_v43  ;;  %v386_v51 = vmax.f32 %v324_v48, 0.0 }
 0x126   :  { %v1023_v50 = vpop.f32.mrb[4].mxu0  ;;  %v387_v52 = vmax.f32 %v327_v49, 0.0 }
 0x127   :  { %v1024_v53 = vpop.f32.mrb[5].mxu0 }
 0x128   :  { %v1025_v54 = vadd.f32 %v1024_v53, %v1023_v50  ;;  %v1026_v55 = vpop.f32.mrb[6].mxu0  ;;  %v402_v56 = vpack.c.bf16 %v387_v52, %v386_v51 }
 0x129   :  { %v1027_v57 = vpop.f32.mrb[7].mxu0 }
 0x12a   :  { %v332_v58 = vadd.f32 %v1025_v54, %v1407_v43  ;;  %v1028_v59 = vadd.f32 %v1027_v57, %v1026_v55  ;;  %1097 = vmatprep.mubr.bf16.mxu1 %v402_v56 }
 0x12c   :  { %v335_v60 = vadd.f32 %v1028_v59, %v1407_v43  ;;  %v388_v61 = vmax.f32 %v332_v58, 0.0 }
 0x12e   :  { %v389_v62 = vmax.f32 %v335_v60, 0.0  ;;  %v1029_v63 = vpop.f32.mrb[8].mxu0 }
 0x12f   :  { %v1030_v0 = vpop.f32.mrb[9].mxu0 }
 0x130   :  { %v1031_v1 = vadd.f32 %v1030_v0, %v1029_v63  ;;  %v1032_v2 = vpop.f32.mrb[10].mxu0  ;;  %v403_v3 = vpack.c.bf16 %v389_v62, %v388_v61 }
 0x131   :  { %v1033_v4 = vpop.f32.mrb[11].mxu0 }
 0x132   :  { %v340_v5 = vadd.f32 %v1031_v1, %v1407_v43  ;;  %v1034_v6 = vadd.f32 %v1033_v4, %v1032_v2  ;;  %1098 = vmatmul.mubr.bf16.vlgmr.msra.gmra.mrb[0].mxu1 %v403_v3  ;;  %v666_v3 = vld [vmem:[#allocation2] sm:$0x1] }
 0x133   :  { %1113 = vpush %v666_v3  ;;  %v1428_v4 = vld [vmem:[%s1559_s4] ss:$0 sm:$0xff] }
 0x134   :  { %v343_v7 = vadd.f32 %v1034_v6, %v1407_v43  ;;  %v390_v8 = vmax.f32 %v340_v5, 0.0 }
 0x136   :  { %v391_v9 = vmax.f32 %v343_v7, 0.0  ;;  %v1035_v10 = vpop.f32.mrb[12].mxu0 }
 0x137   :  { %v1036_v11 = vpop.f32.mrb[13].mxu0 }
 0x138   :  { %v1037_v12 = vadd.f32 %v1036_v11, %v1035_v10  ;;  %v1038_v13 = vpop.f32.mrb[14].mxu0  ;;  %v404_v14 = vpack.c.bf16 %v391_v9, %v390_v8 }
 0x139   :  { %v1039_v15 = vpop.f32.mrb[15].mxu0 }
 0x13a   :  { %v348_v16 = vadd.f32 %v1037_v12, %v1407_v43  ;;  %v1040_v17 = vadd.f32 %v1039_v15, %v1038_v13  ;;  %1101 = vmatprep.mubr.bf16.mxu1 %v404_v14 }
 0x13c   :  { %v351_v18 = vadd.f32 %v1040_v17, %v1407_v43  ;;  %v392_v19 = vmax.f32 %v348_v16, 0.0 }
 0x13e   :  { %v393_v20 = vmax.f32 %v351_v18, 0.0  ;;  %v1041_v21 = vpop.f32.mrb[16].mxu0 }
 0x13f   :  { %v1042_v22 = vpop.f32.mrb[17].mxu0 }
 0x140   :  { %v1043_v23 = vadd.f32 %v1042_v22, %v1041_v21  ;;  %v1044_v24 = vpop.f32.mrb[18].mxu0  ;;  %v405_v25 = vpack.c.bf16 %v393_v20, %v392_v19 }
 0x141   :  { %v1045_v26 = vpop.f32.mrb[19].mxu0 }
 0x142   :  { %v356_v27 = vadd.f32 %v1043_v23, %v1407_v43  ;;  %v1046_v28 = vadd.f32 %v1045_v26, %v1044_v24  ;;  %1102 = vmatmul.mubr.bf16.gmra.mrb[4].mxu1 %v405_v25 }
 0x144   :  { %v359_v29 = vadd.f32 %v1046_v28, %v1407_v43  ;;  %v394_v30 = vmax.f32 %v356_v27, 0.0 }
 0x146   :  { %v395_v31 = vmax.f32 %v359_v29, 0.0  ;;  %v1047_v32 = vpop.f32.mrb[20].mxu0 }
 0x147   :  { %v1048_v33 = vpop.f32.mrb[21].mxu0 }
 0x148   :  { %v1049_v34 = vadd.f32 %v1048_v33, %v1047_v32  ;;  %v1050_v35 = vpop.f32.mrb[22].mxu0  ;;  %v406_v36 = vpack.c.bf16 %v395_v31, %v394_v30 }
 0x149   :  { %v1051_v37 = vpop.f32.mrb[23].mxu0 }
 0x14a   :  { %v364_v38 = vadd.f32 %v1049_v34, %v1407_v43  ;;  %v1052_v39 = vadd.f32 %v1051_v37, %v1050_v35  ;;  %1105 = vmatprep.mubr.bf16.mxu1 %v406_v36 }
 0x14c   :  { %v367_v40 = vadd.f32 %v1052_v39, %v1407_v43  ;;  %v396_v41 = vmax.f32 %v364_v38, 0.0 }
 0x14e   :  { %v397_v42 = vmax.f32 %v367_v40, 0.0  ;;  %v1053_v44 = vpop.f32.mrb[24].mxu0 }
 0x14f   :  { %v1054_v45 = vpop.f32.mrb[25].mxu0 }
 0x150   :  { %v1055_v46 = vadd.f32 %v1054_v45, %v1053_v44  ;;  %v1056_v47 = vpop.f32.mrb[26].mxu0  ;;  %v407_v48 = vpack.c.bf16 %v397_v42, %v396_v41 }
 0x151   :  { %v1057_v49 = vpop.f32.mrb[27].mxu0 }
 0x152   :  { %v372_v50 = vadd.f32 %v1055_v46, %v1407_v43  ;;  %v1058_v51 = vadd.f32 %v1057_v49, %v1056_v47  ;;  %1106 = vmatmul.mubr.bf16.gmra.mrb[8].mxu1 %v407_v48 }
 0x154   :  { %v375_v52 = vadd.f32 %v1058_v51, %v1407_v43  ;;  %v398_v53 = vmax.f32 %v372_v50, 0.0 }
 0x156   :  { %v399_v54 = vmax.f32 %v375_v52, 0.0  ;;  %v1059_v55 = vpop.f32.mrb[28].mxu0 }
 0x157   :  { %v1060_v56 = vpop.f32.mrb[29].mxu0 }
 0x158   :  { %v1061_v57 = vadd.f32 %v1060_v56, %v1059_v55  ;;  %v1062_v58 = vpop.f32.mrb[30].mxu0  ;;  %v408_v59 = vpack.c.bf16 %v399_v54, %v398_v53 }
 0x159   :  { %v1063_v60 = vpop.f32.mrb[31].mxu0 }
 0x15a   :  { %v380_v61 = vadd.f32 %v1061_v57, %v1407_v43  ;;  %v1064_v62 = vadd.f32 %v1063_v60, %v1062_v58  ;;  %1109 = vmatprep.mubr.bf16.mxu1 %v408_v59 }
 0x15c   :  { %v383_v63 = vadd.f32 %v1064_v62, %v1407_v43  ;;  %v400_v0 = vmax.f32 %v380_v61, 0.0  ;;  %v1435_v43 = vld [vmem:[%s1560_s5] ss:$0 sm:$0xff]  ;;  %s1312_s5 = smov [#allocation8]  }
 0x15d   :  { %s932_s24 = sshll.u32 %s1312_s5, 4  ;;  %s933_s24 = int_to_ptr.vmem [resolvable:$true] %s932_s24 }
 0x15e   :  { %v401_v1 = vmax.f32 %v383_v63, 0.0  ;;  %s1278_s25 = scalar_lea.vmem %s933_s24, 16  ;;  %s1282_s0 = scalar_lea.vmem %s933_s24, 32 }
 0x15f   :  { %p1279_p2 = scmp.ne.s32.totalorder %s933_s24, %s1278_s25  ;;  %p1283_p3 = scmp.lt.s32.totalorder %s933_s24, %s933_s24 }
 0x160   :  { %v409_v2 = vpack.c.bf16 %v401_v1, %v400_v0  ;;  %p1284_p4 = scmp.lt.s32.totalorder %s1282_s0, %s1278_s25 }
 0x162   :  { %1110 = vmatmul.mubr.bf16.gmra.mrb[12].mxu1 %v409_v2  ;;  %p1285_p5 = por %p1284_p4, %p1283_p3 }
 0x164   :  { %s1114_s4 = spop %1113  ;;  %p1286_p6 = pnand %p1285_p5, %p1279_p2 }
 0x205   :  { %v1099_v5 = vpop.f32.mrb[0].mxu1 }
 0x206   :  { %v524_v6 = vadd.f32 %v1099_v5, %v1428_v4  ;;  %v515_v7 = vpop.f32.mrb[1].mxu1 }
 0x207   :  { %v516_v8 = vadd.f32 %v1428_v4, %v515_v7  ;;  %v1100_v9 = vpop.f32.mrb[2].mxu1 }
 0x208   :  { %v580_v10 = vmax.f32 %v524_v6, 0.0  ;;  %v527_v11 = vadd.f32 %v1100_v9, %v1428_v4  ;;  %v518_v12 = vpop.f32.mrb[3].mxu1 }
 0x209   :  { %v578_v13 = vmax.f32 %v516_v8, 0.0  ;;  %v519_v14 = vadd.f32 %v1428_v4, %v518_v12 }
 0x20a   :  { %v581_v15 = vmax.f32 %v527_v11, 0.0  ;;  %v603_v16 = vmul.f32 %v1435_v43, %v580_v10 }
 0x20b   :  { %v579_v17 = vmax.f32 %v519_v14, 0.0  ;;  %v601_v18 = vmul.f32 %v1435_v43, %v578_v13 }
 0x20c   :  { %v624_v19 = vsel %vm617_vm0, %v603_v16, 0.0  ;;  %v604_v20 = vmul.f32 %v1435_v43, %v581_v15 }
 0x20d   :  { %625 = vadd.xlane.f32.xlu1 %v624_v19  ;;  %v618_v21 = vsel %vm617_vm0, %v601_v18, 0.0  ;;  %v602_v22 = vmul.f32 %v1435_v43, %v579_v17 }
 0x20e   :  { %619 = vadd.xlane.f32.xlu0 %v618_v21  ;;  %v627_v23 = vsel %vm617_vm0, %v604_v20, 0.0 }
 0x20f   :  { %v621_v24 = vsel %vm617_vm0, %v602_v22, 0.0 }
 0x211   :  { %628 = vadd.xlane.f32.xlu1 %v627_v23 }
 0x212   :  { %622 = vadd.xlane.f32.xlu0 %v621_v24 }
 0x215   :  { %v1103_v25 = vpop.f32.mrb[4].mxu1 }
 0x216   :  { %v540_v26 = vadd.f32 %v1103_v25, %v1428_v4  ;;  %v531_v27 = vpop.f32.mrb[5].mxu1  ;;  %v1483_v25 = vstv %s1114_s4 }
 0x217   :  { %v532_v28 = vadd.f32 %v1428_v4, %v531_v27  ;;  %v1104_v29 = vpop.f32.mrb[6].mxu1 }
 0x218   :  { %v584_v30 = vmax.f32 %v540_v26, 0.0  ;;  %v543_v31 = vadd.f32 %v1104_v29, %v1428_v4  ;;  %v534_v32 = vpop.f32.mrb[7].mxu1 }
 0x219   :  { %v582_v33 = vmax.f32 %v532_v28, 0.0  ;;  %v535_v34 = vadd.f32 %v1428_v4, %v534_v32 }
 0x21a   :  { %v585_v35 = vmax.f32 %v543_v31, 0.0  ;;  %v607_v36 = vmul.f32 %v1435_v43, %v584_v30 }
 0x21b   :  { %v583_v37 = vmax.f32 %v535_v34, 0.0  ;;  %v605_v40 = vmul.f32 %v1435_v43, %v582_v33 }
 0x21c   :  { %v636_v38 = vsel %vm617_vm0, %v607_v36, 0.0  ;;  %v608_v39 = vmul.f32 %v1435_v43, %v585_v35 }
 0x21d   :  { %637 = vadd.xlane.f32.xlu0 %v636_v38  ;;  %v606_v42 = vmul.f32 %v1435_v43, %v583_v37  ;;  %v630_v44 = vsel %vm617_vm0, %v605_v40, 0.0 }
 0x21e   :  { %v639_v41 = vsel %vm617_vm0, %v608_v39, 0.0 }
 0x21f   :  { %640 = vadd.xlane.f32.xlu1 %v639_v41  ;;  %v633_v45 = vsel %vm617_vm0, %v606_v42, 0.0 }
 0x221   :  { %631 = vadd.xlane.f32.xlu0 %v630_v44 }
 0x223   :  { %634 = vadd.xlane.f32.xlu1 %v633_v45 }
 0x225   :  { %v1107_v46 = vpop.f32.mrb[8].mxu1 }
 0x226   :  { %v556_v47 = vadd.f32 %v1107_v46, %v1428_v4  ;;  %v547_v48 = vpop.f32.mrb[9].mxu1 }
 0x227   :  { %v548_v49 = vadd.f32 %v1428_v4, %v547_v48  ;;  %v1108_v50 = vpop.f32.mrb[10].mxu1 }
 0x228   :  { %v588_v51 = vmax.f32 %v556_v47, 0.0  ;;  %v559_v52 = vadd.f32 %v1108_v50, %v1428_v4  ;;  %v550_v53 = vpop.f32.mrb[11].mxu1 }
 0x229   :  { %v586_v54 = vmax.f32 %v548_v49, 0.0  ;;  %v551_v55 = vadd.f32 %v1428_v4, %v550_v53 }
 0x22a   :  { %v589_v56 = vmax.f32 %v559_v52, 0.0  ;;  %v611_v57 = vmul.f32 %v1435_v43, %v588_v51 }
 0x22b   :  { %v587_v58 = vmax.f32 %v551_v55, 0.0  ;;  %v609_v61 = vmul.f32 %v1435_v43, %v586_v54 }
 0x22c   :  { %v648_v59 = vsel %vm617_vm0, %v611_v57, 0.0  ;;  %v612_v60 = vmul.f32 %v1435_v43, %v589_v56 }
 0x22d   :  { %649 = vadd.xlane.f32.xlu0 %v648_v59  ;;  %v610_v63 = vmul.f32 %v1435_v43, %v587_v58  ;;  %v642_v0 = vsel %vm617_vm0, %v609_v61, 0.0 }
 0x22e   :  { %v651_v62 = vsel %vm617_vm0, %v612_v60, 0.0 }
 0x22f   :  { %652 = vadd.xlane.f32.xlu1 %v651_v62  ;;  %v645_v1 = vsel %vm617_vm0, %v610_v63, 0.0  ;;  %v813_v62 = vlaneseq }
 0x231   :  { %643 = vadd.xlane.f32.xlu0 %v642_v0 }
 0x233   :  { %646 = vadd.xlane.f32.xlu1 %v645_v1 }
 0x235   :  { %v1111_v2 = vpop.f32.mrb[12].mxu1 }
 0x236   :  { %v572_v3 = vadd.f32 %v1111_v2, %v1428_v4  ;;  %v563_v5 = vpop.f32.mrb[13].mxu1 }
 0x237   :  { %v564_v6 = vadd.f32 %v1428_v4, %v563_v5  ;;  %v1112_v7 = vpop.f32.mrb[14].mxu1 }
 0x238   :  { %v575_v8 = vadd.f32 %v1112_v7, %v1428_v4  ;;  %v566_v9 = vpop.f32.mrb[15].mxu1  ;;  %v592_v10 = vmax.f32 %v572_v3, 0.0  ;;  %v1497_v7 = vand.u32 127, %v813_v62 }
 0x239   :  { %v590_v11 = vmax.f32 %v564_v6, 0.0  ;;  %v567_v12 = vadd.f32 %v1428_v4, %v566_v9 }
 0x23a   :  { %v593_v13 = vmax.f32 %v575_v8, 0.0  ;;  %v615_v18 = vmul.f32 %v1435_v43, %v592_v10 }
 0x23b   :  { %v591_v14 = vmax.f32 %v567_v12, 0.0  ;;  %v613_v15 = vmul.f32 %v1435_v43, %v590_v11  ;;  %v819_v11 = vadd.s32 4294967288, %v1497_v7 }
 0x23c   :  { %v616_v20 = vmul.f32 %v1435_v43, %v593_v13  ;;  %v660_v21 = vsel %vm617_vm0, %v615_v18, 0.0 }
 0x23d   :  { %v654_v16 = vsel %vm617_vm0, %v613_v15, 0.0  ;;  %v614_v17 = vmul.f32 %v1435_v43, %v591_v14  ;;  %v1500_v14 = vshrl.u32 %v813_v62, 7  ;;  %v826_v15 = vadd.s32 4294967280, %v1497_v7 }
 0x23e   :  { %655 = vadd.xlane.f32.xlu0 %v654_v16  ;;  %v663_v4 = vsel %vm617_vm0, %v616_v20, 0.0  ;;  %v1504_v16 = vadd.s32 4294967272, %v1497_v7 }
 0x23f   :  { %v657_v19 = vsel %vm617_vm0, %v614_v17, 0.0 }
 0x240   :  { %658 = vadd.xlane.f32.xlu1 %v657_v19  ;;  %v822_v19 = vsub.s32 %v819_v11, %v1500_v14 }
 0x242   :  { %661 = vadd.xlane.f32.xlu0 %v660_v21 }
 0x244   :  { %664 = vadd.xlane.f32.xlu1 %v663_v4 }
 0x29a   :  { %v626_v23 = vpop.xlane.xlu1 %625 }
 0x29b   :  { %v620_v22 = vpop.xlane.xlu0 %619  ;;  %v671_v43 = vadd.f32 %v1483_v25, %v626_v23 }
 0x29c   :  { %v669_v28 = vadd.f32 %v1483_v25, %v620_v22 }
 0x29d   :  { %v987_v34 = vmul.f32 -1.442695, %v671_v43 }
 0x29e   :  { %v629_v27 = vpop.xlane.xlu1 %628  ;;  %v985_v32 = vmul.f32 -1.442695, %v669_v28  ;;  %v836_v28 = vsub.s32 %v1504_v16, %v1500_v14 }
 0x29f   :  { %v623_v24 = vpop.xlane.xlu0 %622  ;;  %v672_v30 = vadd.f32 %v1483_v25, %v629_v27  ;;  %v817_v27 = vsub.s32 %v1497_v7, %v1500_v14 }
 0x2a0   :  { %v670_v26 = vadd.f32 %v1483_v25, %v623_v24 }
 0x2a1   :  { %v988_v35 = vmul.f32 -1.442695, %v672_v30 }
 0x2a2   :  { %v986_v29 = vmul.f32 -1.442695, %v670_v26  ;;  %v829_v26 = vsub.s32 %v826_v15, %v1500_v14  ;;  %v875_v15 = vadd.s32 4294967224, %v1497_v7 }
 0x2a4   :  { %1170 = vpow2.f32 %v986_v29 }
 0x2a5   :  { %1172 = vpow2.f32 %v985_v32 }
 0x2a6   :  { %1174 = vpow2.f32 %v987_v34  ;;  %v840_v34 = vadd.s32 4294967264, %v1497_v7 }
 0x2a7   :  { %1176 = vpow2.f32 %v988_v35 }
 0x2aa   :  { %v638_v31 = vpop.xlane.xlu0 %637 }
 0x2ab   :  { %v675_v42 = vadd.f32 %v1483_v25, %v638_v31 }
 0x2ac   :  { %v641_v33 = vpop.xlane.xlu1 %640 }
 0x2ad   :  { %v676_v45 = vadd.f32 %v1483_v25, %v641_v33  ;;  %v991_v46 = vmul.f32 -1.442695, %v675_v42 }
 0x2ae   :  { %v632_v36 = vpop.xlane.xlu0 %631  ;;  %v1171_v44 = vpop.eup %1170 }
 0x2af   :  { %v673_v37 = vadd.f32 %v1483_v25, %v632_v36  ;;  %v1173_v47 = vpop.eup %1172  ;;  %v734_v48 = vadd.f32 1.0, %v1171_v44  ;;  %v992_v51 = vmul.f32 -1.442695, %v676_v45  ;;  %v847_v45 = vadd.s32 4294967256, %v1497_v7 }
 0x2b0   :  { %v635_v38 = vpop.xlane.xlu1 %634  ;;  %v1175_v50 = vpop.eup %1174  ;;  %v733_v54 = vadd.f32 1.0, %v1173_v47 }
 0x2b1   :  { %v989_v39 = vmul.f32 -1.442695, %v673_v37  ;;  %v674_v40 = vadd.f32 %v1483_v25, %v635_v38  ;;  %v1177_v52 = vpop.eup %1176  ;;  %v735_v55 = vadd.f32 1.0, %v1175_v50 }
 0x2b2   :  { %v736_v58 = vadd.f32 1.0, %v1177_v52  ;;  %v843_v52 = vsub.s32 %v840_v34, %v1500_v14 }
 0x2b3   :  { %v990_v41 = vmul.f32 -1.442695, %v674_v40  ;;  %1178 = vpow2.f32 %v989_v39 }
 0x2b5   :  { %1180 = vpow2.f32 %v990_v41 }
 0x2b6   :  { %1182 = vpow2.f32 %v991_v46 }
 0x2b7   :  { %1184 = vrcp.f32 %v734_v48 }
 0x2b8   :  { %1186 = vpow2.f32 %v992_v51 }
 0x2b9   :  { %1188 = vrcp.f32 %v733_v54 }
 0x2ba   :  { %v650_v49 = vpop.xlane.xlu0 %649  ;;  %1190 = vrcp.f32 %v735_v55 }
 0x2bb   :  { %v679_v59 = vadd.f32 %v1483_v25, %v650_v49  ;;  %1192 = vrcp.f32 %v736_v58 }
 0x2bc   :  { %v653_v53 = vpop.xlane.xlu1 %652 }
 0x2bd   :  { %v1179_v57 = vpop.eup %1178  ;;  %v680_v3 = vadd.f32 %v1483_v25, %v653_v53  ;;  %v995_v5 = vmul.f32 -1.442695, %v679_v59  ;;  %v854_v59 = vadd.s32 4294967248, %v1497_v7 }
 0x2be   :  { %v644_v56 = vpop.xlane.xlu0 %643  ;;  %v737_v2 = vadd.f32 1.0, %v1179_v57 }
 0x2bf   :  { %v677_v60 = vadd.f32 %v1483_v25, %v644_v56  ;;  %v1181_v1 = vpop.eup %1180  ;;  %v996_v9 = vmul.f32 -1.442695, %v680_v3  ;;  %v868_v3 = vadd.s32 4294967232, %v1497_v7 }
 0x2c0   :  { %v647_v61 = vpop.xlane.xlu1 %646  ;;  %v738_v8 = vadd.f32 1.0, %v1181_v1  ;;  %v1183_v10 = vpop.eup %1182 }
 0x2c1   :  { %v993_v63 = vmul.f32 -1.442695, %v677_v60  ;;  %v678_v0 = vadd.f32 %v1483_v25, %v647_v61  ;;  %v1185_v12 = vpop.eup %1184  ;;  %v739_v17 = vadd.f32 1.0, %v1183_v10  ;;  %v850_v60 = vsub.s32 %v847_v45, %v1500_v14 }
 0x2c2   :  { %v1187_v13 = vpop.eup %1186  ;;  %v782_v20 = vmul.f32 5.0, %v1185_v12  ;;  %v903_v45 = vadd.s32 4294967192, %v1497_v7 }
 0x2c3   :  { %v994_v6 = vmul.f32 -1.442695, %v678_v0  ;;  %1194 = vpow2.f32 %v993_v63  ;;  %v1189_v18 = vpop.eup %1188  ;;  %v740_v22 = vadd.f32 1.0, %v1187_v13 }
 0x2c4   :  { %v1191_v4 = vpop.eup %1190  ;;  %v781_v30 = vmul.f32 5.0, %v1189_v18  ;;  %v823_v33 = vrot.slane %v782_v20, %v822_v19  ;;  %v871_v18 = vsub.s32 %v868_v3, %v1500_v14 }
 0x2c5   :  { %1196 = vpow2.f32 %v994_v6  ;;  %v1193_v24 = vpop.eup %1192  ;;  %v783_v44 = vmul.f32 5.0, %v1191_v4  ;;  %v857_v6 = vsub.s32 %v854_v59, %v1500_v14 }
 0x2c6   :  { %1198 = vrcp.f32 %v737_v2  ;;  %v818_v47 = vrot.slane %v781_v30, %v817_v27  ;;  %v784_v51 = vmul.f32 5.0, %v1193_v24  ;;  %v861_v2 = vadd.s32 4294967240, %v1497_v7 }
 0x2c7   :  { %1200 = vpow2.f32 %v995_v5  ;;  %v830_v58 = vrot.slane %v783_v44, %v829_v26  ;;  %v882_v26 = vadd.s32 4294967216, %v1497_v7  ;;  %v896_v44 = vadd.s32 4294967200, %v1497_v7 }
 0x2c8   :  { %1202 = vrcp.f32 %v738_v8  ;;  %v825_v55 = vsel %vm824_vm1, %v823_v33, %v818_v47  ;;  %v837_v1 = vrot.slane %v784_v51, %v836_v28  ;;  %v910_v47 = vadd.s32 4294967184, %v1497_v7 }
 0x2c9   :  { %1204 = vpow2.f32 %v996_v9 }
 0x2ca   :  { %1206 = vrcp.f32 %v739_v17  ;;  %v864_v17 = vsub.s32 %v861_v2, %v1500_v14 }
 0x2cb   :  { %v656_v21 = vpop.xlane.xlu0 %655  ;;  %1208 = vrcp.f32 %v740_v22 }
 0x2cc   :  { %v681_v23 = vadd.f32 %v1483_v25, %v656_v21 }
 0x2cd   :  { %v659_v43 = vpop.xlane.xlu1 %658  ;;  %v1195_v29 = vpop.eup %1194 }
 0x2ce   :  { %v682_v31 = vadd.f32 %v1483_v25, %v659_v43  ;;  %v741_v35 = vadd.f32 1.0, %v1195_v29  ;;  %v997_v36 = vmul.f32 -1.442695, %v681_v23  ;;  %v878_v43 = vsub.s32 %v875_v15, %v1500_v14 }
 0x2cf   :  { %v1197_v32 = vpop.eup %1196  ;;  %v662_v37 = vpop.xlane.xlu0 %661 }
 0x2d0   :  { %v1199_v38 = vpop.eup %1198  ;;  %v742_v39 = vadd.f32 1.0, %v1197_v32  ;;  %v998_v40 = vmul.f32 -1.442695, %v682_v31  ;;  %v683_v41 = vadd.f32 %v1483_v25, %v662_v37  ;;  %1210 = vrcp.f32 %v741_v35 }
 0x2d1   :  { %v1201_v42 = vpop.eup %1200  ;;  %v665_v46 = vpop.xlane.xlu1 %664  ;;  %v785_v53 = vmul.f32 5.0, %v1199_v38  ;;  %v885_v37 = vsub.s32 %v882_v26, %v1500_v14 }
 0x2d2   :  { %1212 = vrcp.f32 %v742_v39  ;;  %v999_v48 = vmul.f32 -1.442695, %v683_v41  ;;  %v684_v49 = vadd.f32 %v1483_v25, %v665_v46  ;;  %v1203_v50 = vpop.eup %1202  ;;  %v743_v56 = vadd.f32 1.0, %v1201_v42 }
 0x2d3   :  { %1214 = vpow2.f32 %v997_v36  ;;  %v1205_v54 = vpop.eup %1204  ;;  %v786_v61 = vmul.f32 5.0, %v1203_v50  ;;  %v832_v25 = vsel %vm831_vm2, %v830_v58, %v825_v55  ;;  %v844_v62 = vrot.slane %v785_v53, %v843_v52 }
 0x2d4   :  { %1216 = vpow2.f32 %v998_v40  ;;  %v1000_v57 = vmul.f32 -1.442695, %v684_v49  ;;  %v744_v63 = vadd.f32 1.0, %v1205_v54  ;;  %v1207_v0 = vpop.eup %1206  ;;  %v839_v8 = vsel %vm838_vm3, %v837_v1, %v832_v25 }
 0x2d5   :  { %1218 = vpow2.f32 %v999_v48  ;;  %v1209_v5 = vpop.eup %1208  ;;  %v851_v9 = vrot.slane %v786_v61, %v850_v60  ;;  %v787_v11 = vmul.f32 5.0, %v1207_v0  ;;  %v846_v12 = vsel %vm845_vm4, %v844_v62, %v839_v8 }
 0x2d6   :  { %1220 = vpow2.f32 %v1000_v57  ;;  %v788_v21 = vmul.f32 5.0, %v1209_v5  ;;  %v889_v36 = vadd.s32 4294967208, %v1497_v7  ;;  %v917_v50 = vadd.s32 4294967176, %v1497_v7 }
 0x2d7   :  { %1222 = vrcp.f32 %v743_v56  ;;  %v853_v4 = vsel %vm852_vm5, %v851_v9, %v846_v12  ;;  %v858_v24 = vrot.slane %v787_v11, %v857_v6  ;;  %v899_v52 = vsub.s32 %v896_v44, %v1500_v14 }
 0x2d8   :  { %1224 = vrcp.f32 %v744_v63  ;;  %v865_v35 = vrot.slane %v788_v21, %v864_v17  ;;  %v892_v46 = vsub.s32 %v889_v36, %v1500_v14  ;;  %v906_v54 = vsub.s32 %v903_v45, %v1500_v14 }
 0x2d9   :  { %v860_v31 = vsel %vm859_vm6, %v858_v24, %v853_v4  ;;  %v913_v58 = vsub.s32 %v910_v47, %v1500_v14  ;;  %v920_v25 = vsub.s32 %v917_v50, %v1500_v14 }
 0x2da   :  { %v1211_v10 = vpop.eup %1210  ;;  %v867_v38 = vsel %vm866_vm7, %v865_v35, %v860_v31 }
 0x2db   :  { %v789_v19 = vmul.f32 5.0, %v1211_v10 }
 0x2dc   :  { %v1213_v13 = vpop.eup %1212 }
 0x2dd   :  { %v1215_v16 = vpop.eup %1214  ;;  %v790_v29 = vmul.f32 5.0, %v1213_v13  ;;  %v872_v32 = vrot.slane %v789_v19, %v871_v18 }
 0x2de   :  { %v1217_v20 = vpop.eup %1216  ;;  %v745_v22 = vadd.f32 1.0, %v1215_v16 }
 0x2df   :  { %v1219_v23 = vpop.eup %1218  ;;  %v746_v27 = vadd.f32 1.0, %v1217_v20  ;;  %v879_v39 = vrot.slane %v790_v29, %v878_v43  ;;  %v874_v42 = vsel %vm873_vm8, %v872_v32, %v867_v38 }
 0x2e0   :  { %v1221_v28 = vpop.eup %1220  ;;  %1226 = vrcp.f32 %v745_v22  ;;  %v747_v30 = vadd.f32 1.0, %v1219_v23 }
 0x2e1   :  { %1228 = vrcp.f32 %v746_v27  ;;  %v748_v33 = vadd.f32 1.0, %v1221_v28  ;;  %v1223_v34 = vpop.eup %1222  ;;  %v881_v49 = vsel %vm880_vm9, %v879_v39, %v874_v42 }
 0x2e2   :  { %1230 = vrcp.f32 %v747_v30  ;;  %v1225_v40 = vpop.eup %1224  ;;  %v791_v41 = vmul.f32 5.0, %v1223_v34 }
 0x2e3   :  { %1232 = vrcp.f32 %v748_v33  ;;  %v792_v48 = vmul.f32 5.0, %v1225_v40 }
 0x2e4   :  { %v886_v51 = vrot.slane %v791_v41, %v885_v37 }
 0x2e5   :  { %v893_v60 = vrot.slane %v792_v48, %v892_v46 }
 0x2e6   :  { %v888_v57 = vsel %vm887_vm10, %v886_v51, %v881_v49 }
 0x2e7   :  { %v895_v2 = vsel %vm894_vm11, %v893_v60, %v888_v57 }
 0x2ea   :  { %v1227_v53 = vpop.eup %1226 }
 0x2eb   :  { %v1229_v55 = vpop.eup %1228  ;;  %v793_v56 = vmul.f32 5.0, %v1227_v53 }
 0x2ec   :  { %v1231_v59 = vpop.eup %1230  ;;  %v794_v61 = vmul.f32 5.0, %v1229_v55 }
 0x2ed   :  { %v1233_v62 = vpop.eup %1232  ;;  %v900_v7 = vrot.slane %v793_v56, %v899_v52  ;;  %v795_v63 = vmul.f32 5.0, %v1231_v59 }
 0x2ee   :  { %v907_v0 = vrot.slane %v794_v61, %v906_v54  ;;  %v796_v1 = vmul.f32 5.0, %v1233_v62 }
 0x2ef   :  { %v902_v3 = vsel %vm901_vm12, %v900_v7, %v895_v2  ;;  %v914_v5 = vrot.slane %v795_v63, %v913_v58 }
 0x2f0   :  { %v909_v6 = vsel %vm908_vm13, %v907_v0, %v902_v3  ;;  %v921_v8 = vrot.slane %v796_v1, %v920_v25 }
 0x2f1   :  { %v916_v9 = vsel %vm915_vm14, %v914_v5, %v909_v6 }
 0x2f2   :  { %v923_v10 = vsel %vm922_vm15, %v921_v8, %v916_v9 }
 0x2f3   :  { %925 = vst [vmem:[#allocation8] sm:$0x1] %v923_v10 }
 0x2f4   :  { %1289 = shalt.err (!%p1286_p6)
}
 0x2f5   :  { %s1290_s28 = scalar_lea.hbm %s1562_s7, 16 }
 0x2f6   :  { %p1291_p7 = scmp.ne.s32.totalorder %s1562_s7, %s1290_s28  ;;  %p1294_p8 = scmp.lt.u32.totalorder %s1290_s28, %s1562_s7 }
 0x2f8   :  { %p1296_p9 = pnand %p1294_p8, %p1291_p7 }
 0x2fa   :  { %1299 = shalt.err (!%p1296_p9)
}
 0x2fb   :  { %935 = dma.vmem_to_hbm [thread:$0]  %s933_s24, 16, %s1562_s7, [#allocation5]  }
 0x2fc   :  { %1304 = dma.done.wait [#allocation5], 16  }
 0x2fd   :  { %1305 = vsyncadd [#allocation5], 4294967280 }
 0x2fe   :  { %939 = vsyncpa [#allocation4], 1 }
 0x2ff   :  { %940 = vsyncpa [#allocation7], 1 }
 0x300   :  { %941 = vsyncpa [#allocation5], 1 }

</bundles_post_ra>
